<compile_context>
chip_gen: v6e
topology: v6e:2x2x1
jax: 0.10.0
libtpu: 0.0.40
codegen_flags: <defaults>
</compile_context>

<pallas_src>
import jax
import jax.numpy as jnp
from jax.experimental import pallas as pl
from jax.experimental.pallas import tpu as pltpu

IN_FEATURES = 5
OUT_FEATURES = 5


def net_kernel(x_ref, w_ref, b_ref, o_ref):
    """Fused Linear + log_softmax, batch-on-lanes layout.

    x_ref: (IN,  TB)  f32   -- features on sublanes, batch on lanes
    w_ref: (OUT, IN)  f32   -- torch layout, used directly (no transpose)
    b_ref: (OUT, 1)   f32
    o_ref: (OUT, TB)  f32
    """
    x = x_ref[...]
    w = w_ref[...]
    b = b_ref[...]

    # Linear: y[o, t] = sum_k w[o, k] * x[k, t] + b[o]
    # Statically unrolled VPU broadcast-multiply-accumulate (5 steps).
    y = b + w[:, 0:1] * x[0:1, :]
    for k in range(1, IN_FEATURES):
        y = y + w[:, k:k + 1] * x[k:k + 1, :]

    # Numerically stable log_softmax over the feature axis (axis 0: 5 sublanes).
    m = jnp.max(y, axis=0, keepdims=True)
    s = y - m
    lse = jnp.log(jnp.sum(jnp.exp(s), axis=0, keepdims=True))
    o_ref[...] = (s - lse).astype(o_ref.dtype)


def net_forward(x, w, b, *, tb=1024):
    """x: (B, 5) ; w: (5, 5) torch layout ; b: (5,). Returns (B, 5) f32."""
    batch = x.shape[0]

    # Lane tile must be a multiple of 128; big enough to amortize per-step
    # overhead, but never larger than the (128-rounded) batch itself.
    tb = max(128, (min(int(tb), 4096) // 128) * 128)
    tb = min(tb, pl.cdiv(batch, 128) * 128)
    n_tiles = pl.cdiv(batch, tb)
    padded = n_tiles * tb

    # Batch on the lane axis: transpose once in the wrapper so the kernel sees
    # lane-dense tiles; zero-pad the lane axis up to the tile grid (padded
    # columns produce finite values and are stripped below).
    x_t = jnp.transpose(x).astype(jnp.float32)                 # (IN, B)
    if padded != batch:
        x_t = jnp.pad(x_t, ((0, 0), (0, padded - batch)))
    w_f = w.astype(jnp.float32)                                # (OUT, IN)
    b_col = b.reshape(OUT_FEATURES, 1).astype(jnp.float32)     # (OUT, 1)

    cost = pl.CostEstimate(
        flops=(2 * IN_FEATURES + 4) * OUT_FEATURES * padded,
        transcendentals=(OUT_FEATURES + 1) * padded,
        bytes_accessed=4 * ((IN_FEATURES + OUT_FEATURES) * padded
                            + IN_FEATURES * OUT_FEATURES + OUT_FEATURES),
    )

    out_t = pl.pallas_call(
        net_kernel,
        out_shape=jax.ShapeDtypeStruct((OUT_FEATURES, padded), jnp.float32),
        grid=(n_tiles,),
        in_specs=[
            # x^T: tile the lane (batch) axis.
            pl.BlockSpec((IN_FEATURES, tb), lambda i: (0, i)),
            # W and b: constant index_map -> resident in VMEM across steps.
            pl.BlockSpec((OUT_FEATURES, IN_FEATURES), lambda i: (0, 0)),
            pl.BlockSpec((OUT_FEATURES, 1), lambda i: (0, 0)),
        ],
        out_specs=pl.BlockSpec((OUT_FEATURES, tb), lambda i: (0, i)),
        compiler_params=pltpu.CompilerParams(
            dimension_semantics=("parallel",)),
        cost_estimate=cost,
    )(x_t, w_f, b_col)

    # Strip lane padding and return in the PyTorch (B, out_features) layout.
    return jnp.transpose(out_t[:, :batch])


if __name__ == "__main__":
    key = jax.random.PRNGKey(0)
    kx, kw, kb = jax.random.split(key, 3)

    # Deterministic synthetic parameters (same shapes as nn.Linear(5, 5)).
    bound = 1.0 / (IN_FEATURES ** 0.5)
    w = jax.random.uniform(kw, (OUT_FEATURES, IN_FEATURES),
                           minval=-bound, maxval=bound, dtype=jnp.float32)
    b = jax.random.uniform(kb, (OUT_FEATURES,),
                           minval=-bound, maxval=bound, dtype=jnp.float32)

    # Primary small case, (N, in_features) convention.
    batch = 2
    x = jax.random.normal(kx, (batch, IN_FEATURES), dtype=jnp.float32)
    out = jax.block_until_ready(net_forward(x, w, b))
    ref = jax.nn.log_softmax(x @ w.T + b, axis=-1)
    assert out.shape == (batch, OUT_FEATURES)
    assert jnp.allclose(out, ref, atol=1e-5, rtol=1e-5)

    # Secondary case exercising the batch grid / pipelined path (3 tiles).
    batch2 = 300
    x2 = jax.random.normal(jax.random.PRNGKey(1), (batch2, IN_FEATURES),
                           dtype=jnp.float32)
    out2 = jax.block_until_ready(net_forward(x2, w, b, tb=128))
    ref2 = jax.nn.log_softmax(x2 @ w.T + b, axis=-1)
    assert out2.shape == (batch2, OUT_FEATURES)
    assert jnp.allclose(out2, ref2, atol=1e-5, rtol=1e-5)

    # Larger batch exercising the default (bigger) lane tile.
    batch3 = 3000
    x3 = jax.random.normal(jax.random.PRNGKey(2), (batch3, IN_FEATURES),
                           dtype=jnp.float32)
    out3 = jax.block_until_ready(net_forward(x3, w, b))
    ref3 = jax.nn.log_softmax(x3 @ w.T + b, axis=-1)
    assert out3.shape == (batch3, OUT_FEATURES)
    assert jnp.allclose(out3, ref3, atol=1e-5, rtol=1e-5)

    print("KERNEL_OK")
</pallas_src>

<mosaic_0001>
module attributes {stable_mosaic.version = 11 : i64} {
  func.func @net_kernel(%arg0: i32, %arg1: memref<5x128xf32, #tpu.memory_space<vmem>>, %arg2: memref<5x5xf32, #tpu.memory_space<vmem>>, %arg3: memref<5x1xf32, #tpu.memory_space<vmem>>, %arg4: memref<5x128xf32, #tpu.memory_space<vmem>>) attributes {dimension_semantics = [#tpu.dimension_semantics<parallel>], iteration_bounds = array<i64: 1>, scalar_prefetch = 0 : i64, scratch_operands = 0 : i64, tpu.core_type = #tpu.core_type<tc>, window_params = [{transform_indices = @transform_0, window_bounds = array<i64: 5, 128>}, {pipeline_mode = #tpu.pipeline_mode<synchronous>, transform_indices = @transform_1, window_bounds = array<i64: 5, 5>}, {pipeline_mode = #tpu.pipeline_mode<synchronous>, transform_indices = @transform_2, window_bounds = array<i64: 5, 1>}, {transform_indices = @transform_3, window_bounds = array<i64: 5, 128>}]} {
    %c0 = arith.constant 0 : index
    %c0_0 = arith.constant 0 : index
    %0 = vector.load %arg1[%c0, %c0_0] : memref<5x128xf32, #tpu.memory_space<vmem>>, vector<5x128xf32>
    %c0_1 = arith.constant 0 : index
    %c0_2 = arith.constant 0 : index
    %1 = vector.load %arg2[%c0_1, %c0_2] : memref<5x5xf32, #tpu.memory_space<vmem>>, vector<5x5xf32>
    %c0_3 = arith.constant 0 : index
    %c0_4 = arith.constant 0 : index
    %2 = vector.load %arg3[%c0_3, %c0_4] : memref<5x1xf32, #tpu.memory_space<vmem>>, vector<5x1xf32>
    %3 = vector.extract_strided_slice %1 {offsets = [0, 0], sizes = [5, 1], strides = [1, 1]} : vector<5x5xf32> to vector<5x1xf32>
    %4 = vector.extract_strided_slice %0 {offsets = [0, 0], sizes = [1, 128], strides = [1, 1]} : vector<5x128xf32> to vector<1x128xf32>
    %5 = vector.broadcast %3 : vector<5x1xf32> to vector<5x128xf32>
    %6 = vector.broadcast %4 : vector<1x128xf32> to vector<5x128xf32>
    %7 = arith.mulf %5, %6 : vector<5x128xf32>
    %8 = vector.broadcast %2 : vector<5x1xf32> to vector<5x128xf32>
    %9 = arith.addf %8, %7 : vector<5x128xf32>
    %10 = vector.extract_strided_slice %1 {offsets = [0, 1], sizes = [5, 1], strides = [1, 1]} : vector<5x5xf32> to vector<5x1xf32>
    %11 = vector.extract_strided_slice %0 {offsets = [1, 0], sizes = [1, 128], strides = [1, 1]} : vector<5x128xf32> to vector<1x128xf32>
    %12 = vector.broadcast %10 : vector<5x1xf32> to vector<5x128xf32>
    %13 = vector.broadcast %11 : vector<1x128xf32> to vector<5x128xf32>
    %14 = arith.mulf %12, %13 : vector<5x128xf32>
    %15 = arith.addf %9, %14 : vector<5x128xf32>
    %16 = vector.extract_strided_slice %1 {offsets = [0, 2], sizes = [5, 1], strides = [1, 1]} : vector<5x5xf32> to vector<5x1xf32>
    %17 = vector.extract_strided_slice %0 {offsets = [2, 0], sizes = [1, 128], strides = [1, 1]} : vector<5x128xf32> to vector<1x128xf32>
    %18 = vector.broadcast %16 : vector<5x1xf32> to vector<5x128xf32>
    %19 = vector.broadcast %17 : vector<1x128xf32> to vector<5x128xf32>
    %20 = arith.mulf %18, %19 : vector<5x128xf32>
    %21 = arith.addf %15, %20 : vector<5x128xf32>
    %22 = vector.extract_strided_slice %1 {offsets = [0, 3], sizes = [5, 1], strides = [1, 1]} : vector<5x5xf32> to vector<5x1xf32>
    %23 = vector.extract_strided_slice %0 {offsets = [3, 0], sizes = [1, 128], strides = [1, 1]} : vector<5x128xf32> to vector<1x128xf32>
    %24 = vector.broadcast %22 : vector<5x1xf32> to vector<5x128xf32>
    %25 = vector.broadcast %23 : vector<1x128xf32> to vector<5x128xf32>
    %26 = arith.mulf %24, %25 : vector<5x128xf32>
    %27 = arith.addf %21, %26 : vector<5x128xf32>
    %28 = vector.extract_strided_slice %1 {offsets = [0, 4], sizes = [5, 1], strides = [1, 1]} : vector<5x5xf32> to vector<5x1xf32>
    %29 = vector.extract_strided_slice %0 {offsets = [4, 0], sizes = [1, 128], strides = [1, 1]} : vector<5x128xf32> to vector<1x128xf32>
    %30 = vector.broadcast %28 : vector<5x1xf32> to vector<5x128xf32>
    %31 = vector.broadcast %29 : vector<1x128xf32> to vector<5x128xf32>
    %32 = arith.mulf %30, %31 : vector<5x128xf32>
    %33 = arith.addf %27, %32 : vector<5x128xf32>
    %cst = arith.constant dense<0xFF800000> : vector<128xf32>
    %34 = vector.multi_reduction <maximumf>, %33, %cst [0] : vector<5x128xf32> to vector<128xf32>
    %35 = vector.shape_cast %34 : vector<128xf32> to vector<1x128xf32>
    %36 = vector.broadcast %35 : vector<1x128xf32> to vector<5x128xf32>
    %37 = arith.subf %33, %36 : vector<5x128xf32>
    %38 = math.exp %37 : vector<5x128xf32>
    %cst_5 = arith.constant dense<0.000000e+00> : vector<128xf32>
    %39 = vector.multi_reduction <add>, %38, %cst_5 [0] : vector<5x128xf32> to vector<128xf32>
    %40 = vector.shape_cast %39 : vector<128xf32> to vector<1x128xf32>
    %41 = math.log %40 : vector<1x128xf32>
    %42 = vector.broadcast %41 : vector<1x128xf32> to vector<5x128xf32>
    %43 = arith.subf %37, %42 : vector<5x128xf32>
    %c0_6 = arith.constant 0 : index
    %c0_7 = arith.constant 0 : index
    %44 = vector.load %arg4[%c0_6, %c0_7] : memref<5x128xf32, #tpu.memory_space<vmem>>, vector<5x128xf32>
    tpu.vector_store %arg4[%c0_6, %c0_7], %43 {strides = array<i32>} : memref<5x128xf32, #tpu.memory_space<vmem>>, vector<5x128xf32>,
    return
  }
  func.func @transform_0(%arg0: i32) -> (i32, i32) {
    %c0_i32 = arith.constant 0 : i32
    %c0_i32_0 = arith.constant 0 : i32
    return %c0_i32, %arg0 : i32, i32
  }
  func.func @transform_1(%arg0: i32) -> (i32, i32) {
    %c0_i32 = arith.constant 0 : i32
    %c0_i32_0 = arith.constant 0 : i32
    %c0_i32_1 = arith.constant 0 : i32
    return %c0_i32, %c0_i32_0 : i32, i32
  }
  func.func @transform_2(%arg0: i32) -> (i32, i32) {
    %c0_i32 = arith.constant 0 : i32
    %c0_i32_0 = arith.constant 0 : i32
    %c0_i32_1 = arith.constant 0 : i32
    return %c0_i32, %c0_i32_0 : i32, i32
  }
  func.func @transform_3(%arg0: i32) -> (i32, i32) {
    %c0_i32 = arith.constant 0 : i32
    %c0_i32_0 = arith.constant 0 : i32
    return %c0_i32, %arg0 : i32, i32
  }
}

</mosaic_0001>

<bundles_post_ra>
// kernel: tpu_custom_call.1
= control target key start
LH: loop header
LB: loop body
LE: loop exit
PB: predicated region body
PF: predicated region fallthrough
CT: control target
= control target key end

     0   :  { %8 = vsyncpa [#allocation3], 0  ;;  %s223_s0 = inlined_call_operand.vmem [shape: f32[5,128], index: 0, kind: input, shape index: {}]   ;;  %s224_s1 = inlined_call_operand.hbm [shape: f32[5,5], index: 1, kind: input, shape index: {}]   ;;  %s225_s2 = inlined_call_operand.vmem [shape: f32[5,1], index: 2, kind: input, shape index: {}]   ;;  %s226_s3 = inlined_call_operand.hbm [shape: f32[5,128], index: 3, kind: output, shape index: {}]  }
   0x1   :  { %9 = vsyncpa [#allocation4], 0  ;;  %s184_s12 = smov [#allocation2]  }
   0x2   :  { %s18_s13 = sshll.u32 %s184_s12, 4  ;;  %s19_s13 = int_to_ptr.vmem [resolvable:$true] %s18_s13 }
   0x3   :  { %s148_s14 = scalar_lea.vmem %s19_s13, 128  ;;  %p153_p1 = scmp.lt.s32.totalorder %s19_s13, %s19_s13 }
   0x4   :  { %p149_p0 = scmp.ne.s32.totalorder %s19_s13, %s148_s14  ;;  %p154_p2 = scmp.lt.s32.totalorder %s148_s14, %s148_s14 }
   0x6   :  { %p155_p3 = por %p154_p2, %p153_p1 }
   0x8   :  { %p156_p4 = pnand %p155_p3, %p149_p0 }
   0xa   :  { %159 = shalt.err (!%p156_p4)
}
   0xb   :  { %21 = dma.hbm_to_vmem [thread:$0]  %s224_s1, 128, %s19_s13, [#allocation3]  }
   0xc   :  { %180 = dma.done.wait [#allocation3], 128  }
   0xd   :  { %181 = vsyncadd [#allocation3], 4294967168  ;;  %v185_v0 = vmov 0   ;;  %v186_v1 = vmov 1   ;;  %v28_v2 = vld [vmem:[#allocation2] sm:$0x1f]  ;;  %v35_v7 = vlaneseq }
   0xe   :  { %130 = vset.pattern.permute.xlu0 %v185_v0  ;;  %131 = vset.pattern.permute.xlu1 %v186_v1  ;;  %v29_v3 = vld [vmem:[%s225_s2] sm:$0x1f]  ;;  %v187_v4 = vmov 2   ;;  %v188_v5 = vmov 3   ;;  %v189_v6 = vmov 4   ;;  %vm86_vm0 = vcmask 1044480  }
   0xf   :  { %32 = vperm.xlu0 %130, %v28_v2   ;;  %47 = vperm.xlu1 %131, %v28_v2   ;;  %v36_v8 = vshrl.u32 %v35_v7, 7  ;;  %v27_v10 = vld [vmem:[%s223_s0] sm:$0x1f]  ;;  %s190_s0 = smov [#allocation5]  }
  0x10   :  { %s114_s2 = sshll.u32 %s190_s0, 4  ;;  %s115_s2 = int_to_ptr.vmem [resolvable:$true] %s114_s2 }
  0x11   :  { %v37_v9 = vsub.s32 0, %v36_v8  ;;  %v52_v11 = vsub.s32 1, %v36_v8  ;;  %v62_v12 = vsub.s32 2, %v36_v8  ;;  %v72_v18 = vsub.s32 3, %v36_v8  ;;  %s160_s20 = scalar_lea.vmem %s115_s2, 128  ;;  %p165_p6 = scmp.lt.s32.totalorder %s115_s2, %s115_s2 }
  0x12   :  { %v82_v20 = vsub.s32 4, %v36_v8  ;;  %p161_p5 = scmp.ne.s32.totalorder %s115_s2, %s160_s20  ;;  %p166_p7 = scmp.lt.s32.totalorder %s160_s20, %s160_s20 }
  0x13   :  { %42 = vperm.xlu0 %130, %v29_v3   ;;  %132 = vset.pattern.permute.xlu1 %v187_v4  ;;  %v38_v13 = vrot.slane %v27_v10, %v37_v9  ;;  %v53_v16 = vrot.slane %v27_v10, %v52_v11  ;;  %v63_v17 = vrot.slane %v27_v10, %v62_v12 }
  0x14   :  { %57 = vperm.xlu1 %132, %v28_v2   ;;  %v73_v26 = vrot.slane %v27_v10, %v72_v18  ;;  %v83_v28 = vrot.slane %v27_v10, %v82_v20  ;;  %p167_p8 = por %p166_p7, %p165_p6 }
  0x16   :  { %p168_p9 = pnand %p167_p8, %p161_p5 }
  0x17   :  { %133 = vset.pattern.permute.xlu0 %v188_v5 }
  0x18   :  { %67 = vperm.xlu0 %133, %v28_v2   ;;  %134 = vset.pattern.permute.xlu1 %v189_v6 }
  0x19   :  { %77 = vperm.xlu1 %134, %v28_v2  }
  0x1c   :  { %135 = vset.pattern.permute.xlu0 %v189_v6 }
  0x8a   :  { %v33_v14 = vpop.permute.xlu0 %32  ;;  %v48_v15 = vpop.permute.xlu1 %47 }
  0x8b   :  { %v39_v19 = vmul.f32 %v38_v13, %v33_v14  ;;  %v54_v22 = vmul.f32 %v53_v16, %v48_v15 }
  0x8e   :  { %v43_v21 = vpop.permute.xlu0 %42 }
  0x8f   :  { %v45_v23 = vadd.f32 %v43_v21, %v39_v19  ;;  %v58_v24 = vpop.permute.xlu1 %57 }
  0x90   :  { %v64_v25 = vmul.f32 %v63_v17, %v58_v24 }
  0x91   :  { %v55_v27 = vadd.f32 %v54_v22, %v45_v23 }
  0x93   :  { %v65_v29 = vadd.f32 %v64_v25, %v55_v27  ;;  %v68_v30 = vpop.permute.xlu0 %67 }
  0x94   :  { %v74_v31 = vmul.f32 %v73_v26, %v68_v30  ;;  %v78_v32 = vpop.permute.xlu1 %77 }
  0x95   :  { %v84_v33 = vmul.f32 %v83_v28, %v78_v32 }
  0x96   :  { %v75_v34 = vadd.f32 %v74_v31, %v65_v29 }
  0x98   :  { %v85_v35 = vadd.f32 %v84_v33, %v75_v34 }
  0x9a   :  { %v87_v36 = vsel %vm86_vm0, %v85_v35, -inf }
  0x9b   :  { %v88_v37 = vrot.slane %v87_v36, 4 }
  0x9d   :  { %v89_v38 = vmax.f32 %v87_v36, %v88_v37 }
  0x9f   :  { %v90_v39 = vrot.slane %v89_v38, 2 }
  0xa1   :  { %v91_v40 = vmax.f32 %v89_v38, %v90_v39 }
  0xa3   :  { %v92_v41 = vrot.slane %v91_v40, 1 }
  0xa5   :  { %v93_v42 = vmax.f32 %v91_v40, %v92_v41 }
  0xa7   :  { %v94_v43 = vsub.f32 %v85_v35, %v93_v42 }
  0xa9   :  { %v95_v44 = vmul.f32 1.442695, %v94_v43 }
  0xab   :  { %136 = vpow2.f32 %v95_v44 }
  0xb8   :  { %v137_v45 = vpop.eup %136 }
  0xb9   :  { %v97_v46 = vsel %vm86_vm0, %v137_v45, 0.0 }
  0xba   :  { %v98_v47 = vrot.slane %v97_v46, 4 }
  0xbc   :  { %v99_v48 = vadd.f32 %v98_v47, %v97_v46 }
  0xbe   :  { %v100_v49 = vrot.slane %v99_v48, 2 }
  0xc0   :  { %v101_v50 = vadd.f32 %v100_v49, %v99_v48 }
  0xc2   :  { %v102_v51 = vrot.slane %v101_v50, 1 }
  0xc4   :  { %v103_v52 = vadd.f32 %v102_v51, %v101_v50 }
  0xc6   :  { %138 = vlog2.f32 %v103_v52 }
  0xd3   :  { %v139_v53 = vpop.eup %138 }
  0xd4   :  { %v105_v54 = vmul.f32 0.6931472, %v139_v53 }
  0xd6   :  { %v106_v55 = vsub.f32 %v94_v43, %v105_v54 }
  0xd8   :  { %107 = vst [vmem:[#allocation5] sm:$0x1f] %v106_v55 }
  0xd9   :  { %171 = shalt.err (!%p168_p9)
}
  0xda   :  { %117 = dma.vmem_to_hbm [thread:$0]  %s115_s2, 128, %s226_s3, [#allocation4]  }
  0xdb   :  { %182 = dma.done.wait [#allocation4], 128  }
  0xdc   :  { %183 = vsyncadd [#allocation4], 4294967168 }
  0xdd   :  { %121 = vsyncpa [#allocation3], 1 }
  0xde   :  { %122 = vsyncpa [#allocation4], 1 }

</bundles_post_ra>
